<compile_context>
chip_gen: v7x
topology: tpu7x:2x2x1
jax: 0.10.0
libtpu: 0.0.40
codegen_flags: <defaults>
</compile_context>

<pallas_src>
import functools

import jax
import jax.numpy as jnp
from jax import lax
from jax.experimental import pallas as pl
from jax.experimental.pallas import tpu as pltpu


def _vmem_limit_bytes():
    """Scoped-VMEM request: ~3/4 of per-core VMEM, capped at 96 MiB."""
    try:
        cap = int(pltpu.get_tpu_info().vmem_capacity_bytes)
        return min(3 * cap // 4, 96 * 1024 * 1024)
    except Exception:
        # Safe on every generation (v7x physical VMEM is 64 MiB per TC).
        return 48 * 1024 * 1024


def aue_kernel(pred_ref, labels_ref, out_ref, *, a, q, n_total, tile_n, compute_dtype):
    pid = pl.program_id(0)

    x = pred_ref[...]                               # (tile_n, c) native dtype (DMA'd as-is)
    if x.dtype != compute_dtype:
        x = x.astype(compute_dtype)                 # in-kernel cast (f32, or stay bf16)
    labels = labels_ref[...]                        # (tile_n, 1) i32
    tn, c = x.shape

    # numerically stable softmax pieces (elementwise in compute_dtype)
    row_max = jnp.max(x, axis=1, keepdims=True)
    exps = jnp.exp(x - row_max)                     # (tile_n, c); `shifted` dies here

    # denominator and one-hot numerator reuse `exps`, accumulate in f32
    denom = jnp.sum(exps, axis=1, keepdims=True, dtype=jnp.float32)          # (tile_n, 1)
    col_ids = lax.broadcasted_iota(jnp.int32, (tn, c), 1)
    onehot = col_ids == labels
    numer = jnp.sum(jnp.where(onehot, exps, 0), axis=1, keepdims=True,
                    dtype=jnp.float32)                                       # (tile_n, 1)

    p_y = numer * pl.reciprocal(denom, approx=False)                         # (tile_n, 1)

    # loss_i = ((a - p_y)^q - (a-1)^q) / q
    # pow via exp(q*log(.)): base = a - p_y > a - 1 >= 0 for a > 1 (module default
    # a=1.5); the clamp only guards the degenerate a <= 1 case.
    base = jnp.maximum(a - p_y, 1e-12)
    pow_aq = jnp.exp(q * jnp.log(base))
    const = (a - 1.0) ** q
    loss_row = (pow_aq - const) * (1.0 / q)                                  # (tile_n, 1)

    # mask rows past the true batch size (partial last tile holds garbage rows;
    # jnp.where discards them even if they evaluated to NaN)
    row_ids = pid * tile_n + lax.broadcasted_iota(jnp.int32, (tn, 1), 0)
    loss_row = jnp.where(row_ids < n_total, loss_row, 0.0)

    # per-tile partial sum, written lane-dense (unmasked vst)
    out_ref[...] = jnp.broadcast_to(jnp.sum(loss_row), (1, 8, 128))


def aue_loss(pred, labels, *, a=1.5, q=0.9, scale=1.0, tile_n=1024, compute_dtype=None):
    """Pallas implementation of AUELoss.forward. pred: (N, C), labels: (N,) int."""
    n, c = pred.shape

    # bf16 inputs: keep the big elementwise softmax work in bf16 (v6e/v7x have
    # bf16 VPU/EUP); on v5e callers can pass compute_dtype=jnp.float32.
    if compute_dtype is None:
        compute_dtype = jnp.bfloat16 if pred.dtype == jnp.bfloat16 else jnp.float32
    compute_dtype = jnp.dtype(compute_dtype)

    itemsize = jnp.dtype(pred.dtype).itemsize
    cd_size = compute_dtype.itemsize
    vmem_limit = _vmem_limit_bytes()

    # Real per-row working set: 2x double-buffered native input tile
    # + ~3 compute-dtype intermediates (cast/exps/compare operand) + int32 iota.
    # Keep the tile's working set under ~half the scoped-VMEM request.
    per_row_bytes = c * (2 * itemsize + 3 * cd_size + 4) + 64
    tile_cap = max(8, ((vmem_limit // 2) // per_row_bytes) // 8 * 8)

    n8 = ((n + 7) // 8) * 8
    tile = max(8, min(((tile_n + 7) // 8) * 8, tile_cap, n8))
    # Keep >= 2 grid steps for mid/large N so the "parallel" batch axis can
    # shard across both v7x TensorCores and the pipeline has work to overlap.
    if n >= 16:
        half_n = ((pl.cdiv(n, 2) + 7) // 8) * 8
        tile = max(8, min(tile, half_n))

    num_tiles = pl.cdiv(n, tile)
    labels2d = labels.astype(jnp.int32).reshape(n, 1)

    kernel = functools.partial(
        aue_kernel, a=float(a), q=float(q), n_total=n, tile_n=tile,
        compute_dtype=compute_dtype,
    )

    partials = pl.pallas_call(
        kernel,
        out_shape=jax.ShapeDtypeStruct((num_tiles, 8, 128), jnp.float32),
        grid=(num_tiles,),
        in_specs=[
            # Last dim == full C: no host-side padding / no extra HBM pass.
            pl.BlockSpec((tile, c), lambda i: (i, 0)),
            pl.BlockSpec((tile, 1), lambda i: (i, 0)),
        ],
        out_specs=pl.BlockSpec((1, 8, 128), lambda i: (i, 0, 0)),
        compiler_params=pltpu.CompilerParams(
            dimension_semantics=("parallel",),
            vmem_limit_bytes=vmem_limit,
        ),
        cost_estimate=pl.CostEstimate(
            flops=6 * n * c,
            transcendentals=n * c + 3 * n,
            bytes_accessed=n * c * itemsize + n * 4 + num_tiles * 8 * 128 * 4,
        ),
    )(pred, labels2d)

    return jnp.sum(partials[:, 0, 0]) * (scale / n)


def aue_loss_ref(pred, labels, *, num_classes=None, a=1.5, q=0.9, scale=1.0):
    """Pure-JAX reference mirroring the PyTorch AUELoss module."""
    num_classes = pred.shape[1] if num_classes is None else num_classes
    p = jax.nn.softmax(pred.astype(jnp.float32), axis=1)
    onehot = jax.nn.one_hot(labels, num_classes, dtype=jnp.float32)
    p_y = jnp.sum(onehot * p, axis=1)
    loss = (jnp.power(a - p_y, q) - (a - 1.0) ** q) / q
    return jnp.mean(loss) * scale


if __name__ == "__main__":
    a, q, scale = 1.5, 0.9, 1.0

    key = jax.random.PRNGKey(0)
    k1, k2, k3, k4 = jax.random.split(key, 4)

    # small case matching the module defaults (num_classes=10)
    num_classes, batch = 10, 8
    pred = jax.random.normal(k1, (batch, num_classes), dtype=jnp.float32)
    labels = jax.random.randint(k2, (batch,), 0, num_classes, dtype=jnp.int32)

    out = jax.block_until_ready(aue_loss(pred, labels, a=a, q=q, scale=scale))
    ref = jax.block_until_ready(aue_loss_ref(pred, labels, a=a, q=q, scale=scale))
    assert jnp.allclose(out, ref, rtol=1e-4, atol=1e-5), (out, ref)

    # larger case: multi-tile grid, partial last tile (N % tile != 0),
    # non-multiple-of-128 class dim (no host padding), explicit small tile
    num_classes2, batch2 = 1000, 300
    pred2 = jax.random.normal(k3, (batch2, num_classes2), dtype=jnp.float32)
    labels2 = jax.random.randint(k4, (batch2,), 0, num_classes2, dtype=jnp.int32)

    out2 = jax.block_until_ready(aue_loss(pred2, labels2, a=a, q=q, scale=scale, tile_n=128))
    ref2 = jax.block_until_ready(aue_loss_ref(pred2, labels2, a=a, q=q, scale=scale))
    assert jnp.allclose(out2, ref2, rtol=1e-4, atol=1e-5), (out2, ref2)

    # default (large-tile) path on the same data
    out2b = jax.block_until_ready(aue_loss(pred2, labels2, a=a, q=q, scale=scale))
    assert jnp.allclose(out2b, ref2, rtol=1e-4, atol=1e-5), (out2b, ref2)

    # bf16 input: native-dtype DMA + bf16 elementwise path with f32 accumulation
    pred2_bf16 = pred2.astype(jnp.bfloat16)
    out3 = jax.block_until_ready(aue_loss(pred2_bf16, labels2, a=a, q=q, scale=scale))
    ref3 = jax.block_until_ready(
        aue_loss_ref(pred2_bf16.astype(jnp.float32), labels2, a=a, q=q, scale=scale))
    assert jnp.allclose(out3, ref3, rtol=2e-2, atol=1e-3), (out3, ref3)

    print("KERNEL_OK")
</pallas_src>

<mosaic_0001>
module attributes {stable_mosaic.version = 11 : i64} {
  func.func @aue_kernel(%arg0: i32, %arg1: memref<8x10xf32, #tpu.memory_space<vmem>>, %arg2: memref<8x1xi32, #tpu.memory_space<vmem>>, %arg3: memref<1x8x128xf32, #tpu.memory_space<vmem>>) attributes {dimension_semantics = [#tpu.dimension_semantics<parallel>], iteration_bounds = array<i64: 1>, scalar_prefetch = 0 : i64, scratch_operands = 0 : i64, tpu.core_type = #tpu.core_type<tc>, window_params = [{transform_indices = @transform_0, window_bounds = array<i64: 8, 10>}, {transform_indices = @transform_1, window_bounds = array<i64: 8, 1>}, {transform_indices = @transform_2, window_bounds = array<i64: 1, 8, 128>}]} {
    %c0 = arith.constant 0 : index
    %c0_0 = arith.constant 0 : index
    %0 = vector.load %arg1[%c0, %c0_0] : memref<8x10xf32, #tpu.memory_space<vmem>>, vector<8x10xf32>
    %c0_1 = arith.constant 0 : index
    %c0_2 = arith.constant 0 : index
    %1 = vector.load %arg2[%c0_1, %c0_2] : memref<8x1xi32, #tpu.memory_space<vmem>>, vector<8x1xi32>
    %cst = arith.constant dense<0xFF800000> : vector<8xf32>
    %2 = vector.multi_reduction <maximumf>, %0, %cst [1] : vector<8x10xf32> to vector<8xf32>
    %3 = vector.shape_cast %2 : vector<8xf32> to vector<8x1xf32>
    %4 = vector.broadcast %3 : vector<8x1xf32> to vector<8x10xf32>
    %5 = arith.subf %0, %4 : vector<8x10xf32>
    %6 = math.exp %5 : vector<8x10xf32>
    %cst_3 = arith.constant dense<0.000000e+00> : vector<8xf32>
    %7 = vector.multi_reduction <add>, %6, %cst_3 [1] : vector<8x10xf32> to vector<8xf32>
    %8 = vector.shape_cast %7 : vector<8xf32> to vector<8x1xf32>
    %9 = tpu.iota {dimensions = array<i32: 1>} : vector<8x10xi32>
    %10 = vector.broadcast %1 : vector<8x1xi32> to vector<8x10xi32>
    %11 = arith.cmpi eq, %9, %10 : vector<8x10xi32>
    %c0_i32 = arith.constant 0 : i32
    %12 = arith.sitofp %c0_i32 : i32 to f32
    %13 = vector.broadcast %12 : f32 to vector<8x10xf32>
    %14 = arith.select %11, %6, %13 : vector<8x10xi1>, vector<8x10xf32>
    %cst_4 = arith.constant dense<0.000000e+00> : vector<8xf32>
    %15 = vector.multi_reduction <add>, %14, %cst_4 [1] : vector<8x10xf32> to vector<8xf32>
    %16 = vector.shape_cast %15 : vector<8xf32> to vector<8x1xf32>
    %17 = tpu.reciprocal %8 : vector<8x1xf32> -> vector<8x1xf32>
    %18 = arith.mulf %16, %17 : vector<8x1xf32>
    %cst_5 = arith.constant 1.500000e+00 : f32
    %19 = vector.broadcast %cst_5 : f32 to vector<8x1xf32>
    %20 = arith.subf %19, %18 : vector<8x1xf32>
    %cst_6 = arith.constant 9.99999996E-13 : f32
    %21 = vector.broadcast %cst_6 : f32 to vector<8x1xf32>
    %22 = arith.maximumf %20, %21 : vector<8x1xf32>
    %23 = math.log %22 : vector<8x1xf32>
    %cst_7 = arith.constant 0.899999976 : f32
    %24 = vector.broadcast %cst_7 : f32 to vector<8x1xf32>
    %25 = arith.mulf %24, %23 : vector<8x1xf32>
    %26 = math.exp %25 : vector<8x1xf32>
    %cst_8 = arith.constant 0.535886705 : f32
    %27 = vector.broadcast %cst_8 : f32 to vector<8x1xf32>
    %28 = arith.subf %26, %27 : vector<8x1xf32>
    %cst_9 = arith.constant 1.11111116 : f32
    %29 = vector.broadcast %cst_9 : f32 to vector<8x1xf32>
    %30 = arith.mulf %28, %29 : vector<8x1xf32>
    %c8_i32 = arith.constant 8 : i32
    %31 = arith.muli %arg0, %c8_i32 : i32
    %32 = tpu.iota {dimensions = array<i32: 0>} : vector<8x1xi32>
    %33 = vector.broadcast %31 : i32 to vector<8x1xi32>
    %34 = arith.addi %33, %32 : vector<8x1xi32>
    %c8_i32_10 = arith.constant 8 : i32
    %35 = vector.broadcast %c8_i32_10 : i32 to vector<8x1xi32>
    %36 = arith.cmpi slt, %34, %35 : vector<8x1xi32>
    %cst_11 = arith.constant 0.000000e+00 : f32
    %37 = vector.broadcast %cst_11 : f32 to vector<8x1xf32>
    %38 = arith.select %36, %30, %37 : vector<8x1xi1>, vector<8x1xf32>
    %39 = vector.shape_cast %38 : vector<8x1xf32> to vector<1x8x1xf32>
    %cst_12 = arith.constant dense<0.000000e+00> : vector<1xf32>
    %40 = vector.multi_reduction <add>, %39, %cst_12 [1, 2] : vector<1x8x1xf32> to vector<1xf32>
    %41 = vector.shape_cast %40 : vector<1xf32> to vector<1x1x1xf32>
    %42 = vector.extract %41[0, 0, 0] : f32 from vector<1x1x1xf32>
    %43 = vector.broadcast %42 : f32 to vector<1x8x128xf32>
    %c0_13 = arith.constant 0 : index
    %c0_14 = arith.constant 0 : index
    %c0_15 = arith.constant 0 : index
    %44 = vector.load %arg3[%c0_13, %c0_14, %c0_15] : memref<1x8x128xf32, #tpu.memory_space<vmem>>, vector<1x8x128xf32>
    tpu.vector_store %arg3[%c0_13, %c0_14, %c0_15], %43 {strides = array<i32>} : memref<1x8x128xf32, #tpu.memory_space<vmem>>, vector<1x8x128xf32>,
    return
  }
  func.func @transform_0(%arg0: i32) -> (i32, i32) {
    %c0_i32 = arith.constant 0 : i32
    %c0_i32_0 = arith.constant 0 : i32
    return %arg0, %c0_i32 : i32, i32
  }
  func.func @transform_1(%arg0: i32) -> (i32, i32) {
    %c0_i32 = arith.constant 0 : i32
    %c0_i32_0 = arith.constant 0 : i32
    return %arg0, %c0_i32 : i32, i32
  }
  func.func @transform_2(%arg0: i32) -> (i32, i32, i32) {
    %c0_i32 = arith.constant 0 : i32
    %c0_i32_0 = arith.constant 0 : i32
    %c0_i32_1 = arith.constant 0 : i32
    return %arg0, %c0_i32, %c0_i32_0 : i32, i32, i32
  }
}

</mosaic_0001>

<bundles_post_ra>
// kernel: tpu_custom_call.1
= control target key start
LH: loop header
LB: loop body
LE: loop exit
PB: predicated region body
PF: predicated region fallthrough
CT: control target
= control target key end

     0   :  { %vm14_vm0 = vcmask 80896   ;;  %s155_s0 = inlined_call_operand.vmem [shape: f32[8,10], index: 0, kind: input, shape index: {}]   ;;  %s156_s1 = inlined_call_operand.vmem [shape: s32[8,1], index: 1, kind: input, shape index: {}]   ;;  %s157_s2 = inlined_call_operand.hbm [shape: f32[1,8,128], index: 2, kind: output, shape index: {}]  }
   0x1   :  { %v12_v0 = vld [vmem:[%s155_s0] sm:$0xff] }
   0x2   :  { %7 = vsyncpa [#allocation3], 0  ;;  %v15_v1 = vsel %vm14_vm0, %v12_v0, -inf  ;;  %v117_v2 = vmov 0   ;;  %v13_v3 = vld [vmem:[%s156_s1] sm:$0xff]  ;;  %v24_v7 = vlaneseq  ;;  %vm52_vm2 = vcmask 7168  }
   0x3   :  { %84 = vset.pattern.permute.xlu0 %v117_v2  ;;  %s118_s0 = smov [#allocation2]  }
   0x4   :  { %16 = vmax.xlane.f32.xlu0 %v15_v1  ;;  %v25_v8 = vand.u32 127, %v24_v7  ;;  %s71_s1 = sshll.u32 %s118_s0, 4  ;;  %s72_s1 = int_to_ptr.vmem [resolvable:$true] %s71_s1 }
   0x5   :  { %s93_s14 = scalar_lea.vmem %s72_s1, 128  ;;  %p98_p1 = scmp.lt.s32.totalorder %s72_s1, %s72_s1 }
   0x6   :  { %p94_p0 = scmp.ne.s32.totalorder %s72_s1, %s93_s14  ;;  %p99_p2 = scmp.lt.s32.totalorder %s93_s14, %s93_s14 }
   0x8   :  { %p100_p3 = por %p99_p2, %p98_p1 }
   0xa   :  { %p101_p4 = pnand %p100_p3, %p94_p0 }
  0x1a   :  { %27 = vperm.xlu0 %84, %v13_v3  }
  0x91   :  { %v17_v4 = vpop.xlane.xlu0 %16 }
  0x92   :  { %v18_v5 = vsub.f32 %v12_v0, %v17_v4 }
  0x94   :  { %v19_v6 = vmul.f32 1.442695, %v18_v5 }
  0x96   :  { %85 = vpow2.f32 %v19_v6 }
  0x99   :  { %v28_v9 = vpop.permute.xlu0 %27 }
  0x9a   :  { %vm29_vm1 = vcmp.eq.s32.totalorder %v25_v8, %v28_v9 }
  0xa0   :  { %v86_v10 = vpop.eup %85 }
  0xa1   :  { %v21_v11 = vsel %vm14_vm0, %v86_v10, 0.0  ;;  %v30_v12 = vsel %vm29_vm1, %v86_v10, 0.0 }
  0xa2   :  { %22 = vadd.xlane.f32.xlu1 %v21_v11  ;;  %v31_v13 = vsel %vm14_vm0, %v30_v12, 0.0 }
  0xa6   :  { %32 = vadd.xlane.f32.xlu1 %v31_v13 }
 0x12f   :  { %v23_v14 = vpop.xlane.xlu1 %22 }
 0x130   :  { %87 = vrcp.f32 %v23_v14 }
 0x133   :  { %v33_v16 = vpop.xlane.xlu1 %32 }
 0x13a   :  { %v88_v15 = vpop.eup %87 }
 0x13b   :  { %v35_v17 = vmul.f32 %v88_v15, %v33_v16 }
 0x13d   :  { %v36_v18 = vsub.f32 1.5, %v35_v17 }
 0x13f   :  { %v37_v19 = vmax.f32 %v36_v18, 1e-12 }
 0x141   :  { %89 = vlog2.f32 %v37_v19 }
 0x14b   :  { %v90_v20 = vpop.eup %89 }
 0x14c   :  { %v39_v21 = vmul.f32 0.6931472, %v90_v20 }
 0x14e   :  { %v40_v22 = vmul.f32 0.9, %v39_v21 }
 0x150   :  { %v41_v23 = vmul.f32 1.442695, %v40_v22 }
 0x152   :  { %91 = vpow2.f32 %v41_v23 }
 0x15c   :  { %v92_v24 = vpop.eup %91 }
 0x15d   :  { %v79_v25 = vadd.f32 -0.5358867, %v92_v24 }
 0x15f   :  { %v44_v26 = vmul.f32 1.1111112, %v79_v25 }
 0x161   :  { %v53_v27 = vsel %vm52_vm2, %v44_v26, 0.0 }
 0x162   :  { %54 = vadd.xlane.f32.xlu1 %v53_v27 }
 0x1ef   :  { %v55_v28 = vpop.xlane.xlu1 %54 }
 0x1f0   :  { %v56_v29 = vrot.slane %v55_v28, 4 }
 0x1f2   :  { %v57_v30 = vadd.f32 %v56_v29, %v55_v28 }
 0x1f4   :  { %v58_v31 = vrot.slane %v57_v30, 2 }
 0x1f6   :  { %v59_v32 = vadd.f32 %v58_v31, %v57_v30 }
 0x1f8   :  { %v60_v33 = vrot.slane %v59_v32, 1 }
 0x1fa   :  { %v61_v34 = vadd.f32 %v60_v33, %v59_v32 }
 0x1fc   :  { %80 = vpush %v61_v34 }
 0x22d   :  { %s81_s13 = spop %80 }
 0x22e   :  { %v63_v35 = vstv %s81_s13 }
 0x22f   :  { %64 = vst [vmem:[#allocation2] sm:$0xff] %v63_v35 }
 0x230   :  { %104 = shalt.err (!%p101_p4)
}
 0x231   :  { %s105_s17 = scalar_lea.hbm %s157_s2, 128 }
 0x232   :  { %p106_p5 = scmp.ne.s32.totalorder %s157_s2, %s105_s17  ;;  %p109_p6 = scmp.lt.u32.totalorder %s105_s17, %s157_s2 }
 0x234   :  { %p111_p7 = pnand %p109_p6, %p106_p5 }
 0x236   :  { %114 = shalt.err (!%p111_p7)
}
 0x237   :  { %74 = dma.vmem_to_hbm [thread:$0]  %s72_s1, 128, %s157_s2, [#allocation3]  }
 0x238   :  { %115 = dma.done.wait [#allocation3], 128  }
 0x239   :  { %116 = vsyncadd [#allocation3], 4294967168 }
 0x23a   :  { %78 = vsyncpa [#allocation3], 1 }

</bundles_post_ra>
